<compile_context>
chip_gen: v5e
topology: v5e:2x2
jax: 0.10.0
libtpu: 0.0.40
codegen_flags: <defaults>
</compile_context>

<pallas_src>
import functools

import jax
import jax.numpy as jnp
from jax.experimental import pallas as pl
from jax.experimental.pallas import tpu as pltpu


def _mha_pool_kernel(x_ref, w_ref, out_ref):
    # x_ref:   (gblk, Dh, T)     native dtype  per-(batch, head) channel slab
    # w_ref:   (H, Dh)           f32           shared head weights (fetched once)
    # out_ref: (1, gblk, 2, Dh)  f32           [mean | std] per group
    x = x_ref[...].astype(jnp.float32)                 # accumulate in f32
    w = w_ref[...]
    gblk, dh, t = x.shape
    h = w.shape[0]

    # Groups are (batch, head) flattened and gblk % H == 0, so heads cycle
    # 0..H-1 inside every block: split the leading dim and broadcast the tiny
    # (H, Dh) weight instead of shipping a lane-padded per-group copy from HBM.
    # TODO(synk): on v7x (VPU-bound regime) consider moving this contraction
    # onto the MXU via a batched dot_general; verify with a bundle dump first.
    x4 = x.reshape(gblk // h, h, dh, t)                 # leading-dim split: free
    scores = jnp.sum(x4 * w[None, :, :, None], axis=2, keepdims=True)
    scores = scores.reshape(gblk, 1, t)                 # (gblk, 1, T)

    # Numerically-stable softmax over frames.  The 1/sum(e) normalization is
    # deferred and folded into the final (gblk, Dh) statistics so the big
    # (gblk, Dh, T) slabs see one fewer multiply.
    m = jnp.max(scores, axis=-1, keepdims=True)         # (gblk, 1, 1)
    e = jnp.exp(scores - m)                             # (gblk, 1, T)
    denom = jnp.sum(e, axis=-1, keepdims=True)          # (gblk, 1, 1)
    # EUP approx reciprocal + one Newton step (2 extra VPU ops on a tiny
    # array) so the variance difference does not amplify rcp error.
    inv = pl.reciprocal(denom, approx=True)
    inv = inv * (2.0 - denom * inv)
    inv = inv[:, :, 0]                                  # (gblk, 1)

    # Weighted statistics over frames; reuse wm for the second moment
    # (wm2 = wm * x instead of alpha * x * x).
    wm = e * x                                          # (gblk, Dh, T)
    mean_u = jnp.sum(wm, axis=-1)                       # (gblk, Dh)
    msq_u = jnp.sum(wm * x, axis=-1)                    # (gblk, Dh)

    mean = mean_u * inv
    var = msq_u * inv - mean * mean
    std = jnp.sqrt(jnp.maximum(var, 1e-10))

    # Two slice stores into the (1, gblk, 2, Dh) block: avoids the
    # lane-misaligned concatenate relayout when 2*Dh < 128.
    out_ref[0, :, 0, :] = mean
    out_ref[0, :, 1, :] = std


def _tpu_vmem_config():
    """Returns (vmem_limit_bytes, likely_two_tensorcores).

    v5e/v6e: 128 MiB VMEM, 1 TensorCore -> raise the scoped limit to ~100 MiB.
    v7x:      64 MiB VMEM per TC, 2 TCs -> cap at ~48 MiB and keep >=2 steps.
    """
    cap = 64 << 20  # conservative (v7x-safe) default
    try:
        info = pltpu.get_tpu_info()
        cap = int(getattr(info, "vmem_capacity_bytes", cap))
    except Exception:
        pass
    two_cores = cap <= (64 << 20)
    limit = min(cap - (16 << 20), 100 << 20)   # leave headroom for Mosaic scratch
    limit = max(limit, 16 << 20)
    return int(limit), bool(two_cores)


def _choose_group_block(G, H, Dh, T, vmem_limit, two_cores):
    """Pick (groups-per-step gblk, number of grid steps).

    gblk is a multiple of H so every block holds whole head-cycles (the kernel
    broadcasts the shared (H, Dh) weight).  The x-block budget is
    vmem_limit/5: the double-buffered input block plus the block-sized f32
    temporaries (x*w product, e*x) all live in VMEM at once.
    """
    budget = max(vmem_limit // 5, 1 << 20)
    per_group = max(Dh * T * 4, 1)                     # f32 working-copy bytes
    target = max(H, (budget // per_group) // H * H)
    if two_cores and G > H:
        # 2 TensorCores share the "parallel" grid axis: keep >= 2 grid steps.
        # (An odd step count only idles one TC for the tail step, which is
        # cheaper than padding a whole extra block of x in HBM.)
        target = min(target, max(H, (G // 2) // H * H))
    target = min(target, -(-G // H) * H)

    # Prefer an exact divisor of G near the target (no HBM padding copy of x);
    # otherwise keep the target and pad G up to a multiple of it.
    gblk = target
    cand = target
    while cand >= H:
        if G % cand == 0:
            break
        cand -= H
    if cand >= H and 2 * cand >= target:
        gblk = cand
    nblocks = -(-G // gblk)
    return int(gblk), int(nblocks)


# TODO(synk): for very long frame counts T (block no longer fits the budget at
# gblk=H), tile T with an online-softmax accumulator (running max / denom /
# moments), gating the threshold on the per-generation VMEM size.
@functools.partial(jax.jit, static_argnums=(2,))
def multi_head_attention_pooling(x, weight, num_head):
    """x: (B, D, T); weight: (H, D//H) (TdnnAffine k=1 weight, share=True)."""
    B, D, T = x.shape
    H = num_head
    if D % H != 0:
        raise ValueError(f"input_dim={D} must be divisible by num_head={H}")
    Dh = D // H
    G = B * H

    # Keep x in its native dtype (bf16/f16/f32): the kernel casts to f32.
    # TODO(synk): share=False (per-group, per-batch weights) is not supported
    # by this weight layout.
    xg = x.reshape(G, Dh, T)                 # (B, D, T) -> (B*H, Dh, T): free
    w = weight.astype(jnp.float32)           # tiny (H, Dh), fetched once

    vmem_limit, two_cores = _tpu_vmem_config()
    gblk, nblocks = _choose_group_block(G, H, Dh, T, vmem_limit, two_cores)
    G_pad = gblk * nblocks
    if G_pad != G:
        # Padded groups see all-zero frames -> uniform softmax, zero stats;
        # they are sliced off below, so this is numerically safe.
        xg = jnp.pad(xg, ((0, G_pad - G), (0, 0), (0, 0)))

    out = pl.pallas_call(
        _mha_pool_kernel,
        out_shape=jax.ShapeDtypeStruct((nblocks, gblk, 2, Dh), jnp.float32),
        grid_spec=pltpu.PrefetchScalarGridSpec(
            num_scalar_prefetch=0,
            grid=(nblocks,),
            in_specs=[
                pl.BlockSpec((gblk, Dh, T), lambda g: (g, 0, 0)),
                # Constant index_map: the shared head weights are DMA'd once
                # and stay resident across the whole grid.
                pl.BlockSpec((H, Dh), lambda g: (0, 0)),
            ],
            out_specs=pl.BlockSpec((1, gblk, 2, Dh), lambda g: (g, 0, 0, 0)),
        ),
        compiler_params=pltpu.CompilerParams(
            dimension_semantics=("parallel",),
            vmem_limit_bytes=vmem_limit,
        ),
    )(xg, w)

    # (nblocks, gblk, 2, Dh) -> (B, H, 2, Dh) -> (B, 2*D) == cat([mean, std], 1)
    out = out.reshape(G_pad, 2, Dh)[:G].reshape(B, H, 2, Dh)
    mean = out[:, :, 0, :].reshape(B, D)
    std = out[:, :, 1, :].reshape(B, D)
    return jnp.concatenate([mean, std], axis=1).astype(x.dtype)


def _reference(x, weight, H):
    # pure-JAX reference mirroring the PyTorch forward (exact division)
    B, D, T = x.shape
    Dh = D // H
    xh = x.reshape(B, H, Dh, T)
    scores = jnp.einsum('hd,bhdt->bht', weight, xh)
    alpha = jax.nn.softmax(scores, axis=-1)                 # (B, H, T)
    after = alpha[:, :, None, :] * xh
    mean = jnp.sum(after, axis=-1).reshape(B, D)
    after2 = alpha[:, :, None, :] * (xh ** 2)
    var = jnp.sum(after2, axis=-1).reshape(B, D) - mean ** 2
    std = jnp.sqrt(jnp.maximum(var, 1e-10))
    return jnp.concatenate([mean, std], axis=1)


if __name__ == "__main__":
    B, D, T, H = 2, 16, 16, 4          # input_dim=16, num_head=4, chunk_size=16

    key = jax.random.PRNGKey(0)
    kx, kw = jax.random.split(key)
    x = jax.random.normal(kx, (B, D, T), dtype=jnp.float32)
    # TdnnAffine.init_weight: normal(0, 0.01), bias=False; kernel dim (=1) squeezed
    weight = 0.01 * jax.random.normal(kw, (H, D // H), dtype=jnp.float32)

    out = multi_head_attention_pooling(x, weight, H)
    out = jax.block_until_ready(out)

    ref = _reference(x, weight, H)
    assert out.shape == (B, 2 * D)
    assert jnp.allclose(out, ref, atol=1e-4, rtol=1e-4), "mismatch vs reference"

    print("KERNEL_OK")
</pallas_src>

<mosaic_0001>
module attributes {stable_mosaic.version = 11 : i64} {
  func.func @_mha_pool_kernel(%arg0: i32, %arg1: memref<4x4x16xf32, #tpu.memory_space<vmem>>, %arg2: memref<4x4xf32, #tpu.memory_space<vmem>>, %arg3: memref<1x4x2x4xf32, #tpu.memory_space<vmem>>) attributes {dimension_semantics = [#tpu.dimension_semantics<parallel>], iteration_bounds = array<i64: 2>, scalar_prefetch = 0 : i64, scratch_operands = 0 : i64, tpu.core_type = #tpu.core_type<tc>, window_params = [{transform_indices = @transform_0, window_bounds = array<i64: 4, 4, 16>}, {pipeline_mode = #tpu.pipeline_mode<synchronous>, transform_indices = @transform_1, window_bounds = array<i64: 4, 4>}, {transform_indices = @transform_2, window_bounds = array<i64: 1, 4, 2, 4>}]} {
    %c0 = arith.constant 0 : index
    %c0_0 = arith.constant 0 : index
    %c0_1 = arith.constant 0 : index
    %0 = vector.load %arg1[%c0, %c0_0, %c0_1] : memref<4x4x16xf32, #tpu.memory_space<vmem>>, vector<4x4x16xf32>
    %c0_2 = arith.constant 0 : index
    %c0_3 = arith.constant 0 : index
    %1 = vector.load %arg2[%c0_2, %c0_3] : memref<4x4xf32, #tpu.memory_space<vmem>>, vector<4x4xf32>
    %2 = vector.shape_cast %0 : vector<4x4x16xf32> to vector<1x4x4x16xf32>
    %3 = vector.shape_cast %1 : vector<4x4xf32> to vector<1x4x4x1xf32>
    %4 = vector.broadcast %3 : vector<1x4x4x1xf32> to vector<1x4x4x16xf32>
    %5 = arith.mulf %2, %4 : vector<1x4x4x16xf32>
    %cst = arith.constant dense<0.000000e+00> : vector<1x4x16xf32>
    %6 = vector.multi_reduction <add>, %5, %cst [2] : vector<1x4x4x16xf32> to vector<1x4x16xf32>
    %7 = vector.shape_cast %6 : vector<1x4x16xf32> to vector<1x4x1x16xf32>
    %8 = vector.shape_cast %7 : vector<1x4x1x16xf32> to vector<4x1x16xf32>
    %cst_4 = arith.constant dense<0xFF800000> : vector<4x1xf32>
    %9 = vector.multi_reduction <maximumf>, %8, %cst_4 [2] : vector<4x1x16xf32> to vector<4x1xf32>
    %10 = vector.shape_cast %9 : vector<4x1xf32> to vector<4x1x1xf32>
    %11 = vector.broadcast %10 : vector<4x1x1xf32> to vector<4x1x16xf32>
    %12 = arith.subf %8, %11 : vector<4x1x16xf32>
    %13 = math.exp %12 : vector<4x1x16xf32>
    %cst_5 = arith.constant dense<0.000000e+00> : vector<4x1xf32>
    %14 = vector.multi_reduction <add>, %13, %cst_5 [2] : vector<4x1x16xf32> to vector<4x1xf32>
    %15 = vector.shape_cast %14 : vector<4x1xf32> to vector<4x1x1xf32>
    %16 = tpu.reciprocal %15 {approx = true} : vector<4x1x1xf32> -> vector<4x1x1xf32>
    %17 = arith.mulf %15, %16 : vector<4x1x1xf32>
    %cst_6 = arith.constant 2.000000e+00 : f32
    %18 = vector.broadcast %cst_6 : f32 to vector<4x1x1xf32>
    %19 = arith.subf %18, %17 : vector<4x1x1xf32>
    %20 = arith.mulf %16, %19 : vector<4x1x1xf32>
    %21 = vector.shape_cast %20 : vector<4x1x1xf32> to vector<4x1xf32>
    %22 = vector.broadcast %13 : vector<4x1x16xf32> to vector<4x4x16xf32>
    %23 = arith.mulf %22, %0 : vector<4x4x16xf32>
    %cst_7 = arith.constant dense<0.000000e+00> : vector<4x4xf32>
    %24 = vector.multi_reduction <add>, %23, %cst_7 [2] : vector<4x4x16xf32> to vector<4x4xf32>
    %25 = arith.mulf %23, %0 : vector<4x4x16xf32>
    %cst_8 = arith.constant dense<0.000000e+00> : vector<4x4xf32>
    %26 = vector.multi_reduction <add>, %25, %cst_8 [2] : vector<4x4x16xf32> to vector<4x4xf32>
    %27 = vector.broadcast %21 : vector<4x1xf32> to vector<4x4xf32>
    %28 = arith.mulf %24, %27 : vector<4x4xf32>
    %29 = vector.broadcast %21 : vector<4x1xf32> to vector<4x4xf32>
    %30 = arith.mulf %26, %29 : vector<4x4xf32>
    %31 = arith.mulf %28, %28 : vector<4x4xf32>
    %32 = arith.subf %30, %31 : vector<4x4xf32>
    %cst_9 = arith.constant 1.000000e-10 : f32
    %33 = vector.broadcast %cst_9 : f32 to vector<4x4xf32>
    %34 = arith.maximumf %32, %33 : vector<4x4xf32>
    %35 = math.sqrt %34 : vector<4x4xf32>
    %c0_10 = arith.constant 0 : index
    %c0_11 = arith.constant 0 : index
    %c0_12 = arith.constant 0 : index
    %c0_13 = arith.constant 0 : index
    %36 = vector.load %arg3[%c0_10, %c0_11, %c0_12, %c0_13] : memref<1x4x2x4xf32, #tpu.memory_space<vmem>>, vector<1x4x1x4xf32>
    %37 = vector.shape_cast %36 : vector<1x4x1x4xf32> to vector<4x4xf32>
    %38 = vector.shape_cast %28 : vector<4x4xf32> to vector<1x4x1x4xf32>
    tpu.vector_store %arg3[%c0_10, %c0_11, %c0_12, %c0_13], %38 {strides = array<i32>} : memref<1x4x2x4xf32, #tpu.memory_space<vmem>>, vector<1x4x1x4xf32>,
    %c0_14 = arith.constant 0 : index
    %c0_15 = arith.constant 0 : index
    %c1 = arith.constant 1 : index
    %c0_16 = arith.constant 0 : index
    %39 = vector.load %arg3[%c0_14, %c0_15, %c1, %c0_16] : memref<1x4x2x4xf32, #tpu.memory_space<vmem>>, vector<1x4x1x4xf32>
    %40 = vector.shape_cast %39 : vector<1x4x1x4xf32> to vector<4x4xf32>
    %41 = vector.shape_cast %35 : vector<4x4xf32> to vector<1x4x1x4xf32>
    tpu.vector_store %arg3[%c0_14, %c0_15, %c1, %c0_16], %41 {strides = array<i32>} : memref<1x4x2x4xf32, #tpu.memory_space<vmem>>, vector<1x4x1x4xf32>,
    return
  }
  func.func @transform_0(%arg0: i32) -> (i32, i32, i32) {
    %c0_i32 = arith.constant 0 : i32
    %c0_i32_0 = arith.constant 0 : i32
    %c0_i32_1 = arith.constant 0 : i32
    return %arg0, %c0_i32, %c0_i32_0 : i32, i32, i32
  }
  func.func @transform_1(%arg0: i32) -> (i32, i32) {
    %c0_i32 = arith.constant 0 : i32
    %c0_i32_0 = arith.constant 0 : i32
    %c0_i32_1 = arith.constant 0 : i32
    return %c0_i32, %c0_i32_0 : i32, i32
  }
  func.func @transform_2(%arg0: i32) -> (i32, i32, i32, i32) {
    %c0_i32 = arith.constant 0 : i32
    %c0_i32_0 = arith.constant 0 : i32
    %c0_i32_1 = arith.constant 0 : i32
    %c0_i32_2 = arith.constant 0 : i32
    return %arg0, %c0_i32, %c0_i32_0, %c0_i32_1 : i32, i32, i32, i32
  }
}

</mosaic_0001>

<bundles_post_ra>
// kernel: squeeze.2
= control target key start
LH: loop header
LB: loop body
LE: loop exit
PB: predicated region body
PF: predicated region fallthrough
CT: control target
= control target key end

     0   :  { %s29_s10 = smov 3  ;;  %s45_s11 = smov 12   ;;  %vm12_vm0 = vcmask 31744   ;;  %vm19_vm1 = vcmask 130144   ;;  %vm26_vm2 = vcmask 97344   ;;  %vm33_vm3 = vcmask 64544   ;;  %s67_s0 = inlined_call_operand.vmem [shape: f32[2,4,4], index: 0, kind: input, shape index: {}]   ;;  %s68_s1 = inlined_call_operand.vmem [shape: f32[2,16], index: 1, kind: output, shape index: {}]  }
   0x1   :  { %v41_v0 = vld [vmem:[%s67_s0 + $0x4] sm:$0xf]  ;;  %v8_v1 = vld [vmem:[%s67_s0] sm:$0xf]  ;;  %s15_s0 = smov 3  ;;  %s46_s12 = smov 4  }
   0x2   :  { %7 = vst [vmem:[#allocation1 + $0x8] sm:$0xf] %v41_v0  ;;  %s22_s13 = smov 3  ;;  %s47_s14 = smov 8  }
   0x3   :  { %9 = vst [vmem:[#allocation1] sm:$0xf] %v8_v1  ;;  %s10_s15 = smov 3 }
   0xa   :  { %v16_v2 = vld [vmem:[#allocation1 + $0x3] ss:$8 sm:%s15_s0]   ;;  %v30_v3 = vld [vmem:[#allocation1 + $0x1] ss:$8 sm:%s29_s10]   ;;  %v23_v4 = vld [vmem:[#allocation1 + $0x2] ss:$8 sm:%s22_s13]  }
   0xb   :  { %17 = vrot.lane.b32.xlu0 %v16_v2, %s45_s11  ;;  %31 = vrot.lane.b32.xlu1 %v30_v3, %s46_s12  ;;  %v11_v5 = vld [vmem:[#allocation1] ss:$8 sm:%s10_s15]  }
   0xc   :  { %13 = vst.msk [vmem:[#allocation0] sm:$0x3] %vm12_vm0, %v11_v5  }
  0x13   :  { %24 = vrot.lane.b32.xlu0 %v23_v4, %s47_s14 }
  0x7d   :  { %v18_v6 = vpop.permute.xlu0 %17   ;;  %v32_v7 = vpop.permute.xlu1 %31  }
  0x7e   :  { %20 = vst.msk [vmem:[#allocation0] sm:$0x3] %vm19_vm1, %v18_v6  }
  0x85   :  { %v25_v8 = vpop.permute.xlu0 %24  }
  0x86   :  { %27 = vst.msk [vmem:[#allocation0] sm:$0x3] %vm26_vm2, %v25_v8  }
  0x87   :  { %34 = vst.msk [vmem:[#allocation0] sm:$0x3] %vm33_vm3, %v32_v7  }
  0x8e   :  { %v37_v9 = vld [vmem:[#allocation0] sm:$0x3] }
  0x8f   :  { %40 = vst [vmem:[%s68_s1] sm:$0x3] %v37_v9 }

// kernel: multi_head_attention_pooling.1
= control target key start
LH: loop header
LB: loop body
LE: loop exit
PB: predicated region body
PF: predicated region fallthrough
CT: control target
= control target key end

     0   :  { %7 = vsyncpa [#allocation3], 0  ;;  %s910_s0 = inlined_call_operand.hbm [shape: f32[8,4,16], index: 0, kind: input, shape index: {}]   ;;  %s911_s1 = inlined_call_operand.hbm [shape: f32[4,4], index: 1, kind: input, shape index: {}]   ;;  %s912_s2 = inlined_call_operand.vmem [shape: f32[2,4,2,4], index: 2, kind: output, shape index: {}]  }
   0x1   :  { %9 = vsyncpa [#allocation3 + $0x1], 0 }
   0x2   :  { %10 = vsyncpa [#allocation5], 0  ;;  %s725_s9 = smov 0   ;;  %s727_s10 = smov 0  }
   0x3   :  { %s729_s11 = smov 0   ;;  %s731_s12 = smov 0  }
   0x4 LB: > { %s744_s13 = sadd.s32 4294967295, %s705_s12   ;;  %s747_s14 = sadd.s32 1, %s705_s12   ;;  %s705_s12 = sphi %s731_s12, %s920_s12   ;;  %s701_s11 = sphi %s729_s11, %s919_s11   ;;  %s697_s10 = sphi %s727_s10, %s918_s10   ;;  %s693_s9 = sphi %s725_s9, %s917_s9  }
   0x5   : > { %s20_s15 = ssub.s32 %s705_s12, %s747_s14  ;;  %s23_s16 = sadd.s32 1, %s701_s11 }
   0x6   : > { %p21_p0 = scmp.eq.s32.totalorder %s20_s15, 0  ;;  %p30_p1 = scmp.ne.s32.totalorder %s701_s11, %s697_s10 }
   0x7   : > { %p31_p2 = scmp.eq.s32.totalorder %s705_s12, 0  ;;  %p36_p3 = scmp.ne.s32.totalorder %s697_s10, %s693_s9 }
   0x8   : > { %s757_s17 = scalar_select %p21_p0, %s701_s11, %s23_s16  }
   0x9   : > { %p759_p4 = por %p31_p2, %p30_p1  ;;  %p37_p5 = scmp.eq.s32.totalorder %s744_s13, 0 }
   0xa   : > { %p514_p6 = scmp.ge.s32.totalorder %s705_s12, 1  ;;  %p94_p7 = scmp.lt.s32.totalorder %s705_s12, 3 }
   0xb   : > { %p768_p8 = por %p37_p5, %p36_p3  ;;  %s106_s23 = sshll.u32 %s911_s1, 4  ;;  %s107_s23 = int_to_ptr.hbm [resolvable:$true] %s106_s23 }
   0xc   : > { %p772_p9 = pnand %p514_p6, %p94_p7  ;;  %s707_s24 = smov [#allocation4]  }
   0xd   : > { %s108_s25 = sshll.u32 %s707_s24, 4  ;;  %p544_p12 = scmp.lt.s32.totalorder %s705_s12, 2  ;;  %s109_s25 = int_to_ptr.vmem [resolvable:$true] %s108_s25 }
   0xe   : > { %p535_p10 = pneg %p772_p9  ;;  %s119_s26 = sand.u32 1, %s701_s11  }
   0xf   : > { %s527_s27 = sshll.u32 %s705_s12, 4  ;;  %p788_p13 = pnand %p544_p12, %p759_p4 }
  0x10   : > { %p536_p11 = pnand %p535_p10, %p37_p5  ;;  %s517_s29 = sshll.u32 %s119_s26, 4 }
  0x11   : > { %s128_s4 = scalar_lea.hbm %s910_s0, %s527_s27  ;;  %s123_s6 = scalar_lea.vmem [#allocation2], %s517_s29 }
  0x12   : > { %538 = dma.hbm_to_vmem [thread:$0]  (!%p536_p11), %s107_s23, 64, %s109_s25, [#allocation5]  }
  0x13   : > { %s129_s5 = sshll.u32 %s128_s4, 4  ;;  %s131_s7 = sshll.u32 %s123_s6, 4  ;;  %s130_s5 = int_to_ptr.hbm [resolvable:$true] %s129_s5  ;;  %s132_s7 = int_to_ptr.vmem [resolvable:$true] %s131_s7 }
  0x14   : > { %s120_s8 = scalar_lea.sflag [#allocation3], %s119_s26  ;;  %s637_s9 = sshra.s32 %s130_s5, 4  ;;  %s638_s9 = int_to_ptr.hbm [resolvable:$true] %s637_s9 }
  0x15   : > { %s639_s12 = scalar_lea.hbm %s638_s9, 16  ;;  %p641_p1 = pneg %p788_p13 }
  0x16   : > { %p640_p0 = scmp.ne.s32.totalorder %s638_s9, %s639_s12  ;;  %s644_s18 = scalar_lea.hbm %s910_s0, 32 }
  0x17   : > { %p645_p4 = scmp.lt.s32.totalorder %s638_s9, %s910_s0  ;;  %p646_p6 = scmp.lt.s32.totalorder %s644_s18, %s639_s12 }
  0x18   : > { %p642_p2 = pnand %p641_p1, %p640_p0 }
  0x19   : > { %p647_p7 = por %p646_p6, %p645_p4 }
  0x1a   : > { %p643_p3 = pneg %p642_p2 }
  0x1c   : > { %p648_p10 = pnand %p647_p7, %p643_p3 }
  0x1e   : > { %651 = shalt.err (!%p648_p10)
}
  0x1f   : > { %s708_s23 = smov 64   ;;  %s709_s24 = smov 4  }
  0x20   : > { %542 = dma.hbm_to_vmem [thread:$0]  (!%p788_p13), %s130_s5, 256, %s132_s7, %s120_s8, %s708_s23, %s708_s23, %s709_s24  }
  0x21   : > { %143 = sbr.rel (%p772_p9) target bundleno = 515 (0x203), region = 28  ;;  %s145_s25 = sand.u32 (!%p772_p9), 1, %s697_s10  }
  0x22   : > { %s521_s26 = sshll.u32 (!%p772_p9), %s145_s25, 4  ;;  %s146_s27 = scalar_lea.sflag (!%p772_p9), [#allocation3], %s145_s25 }
  0x23   : > { %s808_s29 = scalar_lea.vmem (!%p772_p9), [#allocation2], %s521_s26 }
  0x26   : > { %684 = dma.done.wait (%p768_p8), %s146_s27, 256  }
  0x27   : > { %686 = vsyncadd (%p768_p8), %s146_s27, 4294967040 }
  0x28   : > { %688 = dma.done.wait (%p37_p5), [#allocation5], 64  }
  0x29   : > { %690 = vsyncadd (%p37_p5), [#allocation5], 4294967232  ;;  %v188_v0 = vlaneseq  ;;  %v186_v2 = vld [vmem:[#allocation4] sm:$0xf]  ;;  %v820_v7 = vld [vmem:[%s808_s29 + $0x8] sm:$0xf] }
  0x2a   : > { %v201_v3 = vperm.slane %v186_v2, 2  ;;  %v187_v4 = vperm.slane %v186_v2, 0  ;;  %v208_v5 = vperm.slane %v186_v2, 3  ;;  %v194_v6 = vperm.slane %v186_v2, 1  ;;  %v823_v8 = vld [vmem:[%s808_s29] sm:$0xf] }
  0x2b   : > { %v189_v1 = vshrl.u32 %v188_v0, 7  ;;  %vm219_vm0 = vcmask 125952   ;;  %v830_v19 = vld [vmem:[%s808_s29 + $0xc] sm:$0xf]  ;;  %v833_v20 = vld [vmem:[%s808_s29 + $0x4] sm:$0xf] }
  0x2c   : > { %vm248_vm1 = vcmask 130048   ;;  %p177_p5 = scmp.lt.s32.totalorder %s744_s13, 1  ;;  %vm415_vm2 = vcmask 24576  }
  0x2d   : > { %582 = vset.pattern.permute.xlu1 %v189_v1  ;;  %581 = vset.pattern.permute.xlu0 %v189_v1 }
  0x2e   : > { %s922_s13 = smov (!%p177_p5, %s744_s13), 1 }
  0x2f   : > { %s528_s19 = sshll.u32 %s922_s13, 3 }
  0x30   : > { %s871_s30 = scalar_lea.vmem %s912_s2, %s528_s19 }
  0x35   : > { %206 = vperm.xlu1 %582, %v201_v3   ;;  %192 = vperm.xlu0 %581, %v187_v4  }
  0x3d   : > { %213 = vperm.xlu1 %582, %v208_v5   ;;  %199 = vperm.xlu0 %581, %v194_v6  }
  0xa7   : > { %v207_v9 = vpop.permute.xlu1 %206  ;;  %v193_v10 = vpop.permute.xlu0 %192 }
  0xa8   : > { %v217_v11 = vmul.f32 %v207_v9, %v820_v7  ;;  %v215_v12 = vmul.f32 %v193_v10, %v823_v8 }
  0xaa   : > { %v234_v13 = vsel %vm219_vm0, %v217_v11, 0.0  ;;  %v220_v14 = vsel %vm219_vm0, %v215_v12, 0.0 }
  0xab   : > { %v235_v15 = vrot.slane %v234_v13, 4  ;;  %v221_v16 = vrot.slane %v220_v14, 4 }
  0xad   : > { %v236_v17 = vadd.f32 %v235_v15, %v234_v13  ;;  %v222_v18 = vadd.f32 %v221_v16, %v220_v14 }
  0xaf   : > { %v237_v21 = vrot.slane %v236_v17, 2  ;;  %v223_v22 = vrot.slane %v222_v18, 2  ;;  %v214_v23 = vpop.permute.xlu1 %213  ;;  %v200_v24 = vpop.permute.xlu0 %199 }
  0xb0   : > { %v218_v25 = vmul.f32 %v214_v23, %v830_v19  ;;  %v216_v26 = vmul.f32 %v200_v24, %v833_v20 }
  0xb1   : > { %v238_v27 = vadd.f32 %v237_v21, %v236_v17  ;;  %v224_v28 = vadd.f32 %v223_v22, %v222_v18 }
  0xb2   : > { %v241_v29 = vsel %vm219_vm0, %v218_v25, 0.0  ;;  %v227_v30 = vsel %vm219_vm0, %v216_v26, 0.0 }
  0xb3   : > { %v242_v31 = vrot.slane %v241_v29, 4  ;;  %v228_v32 = vrot.slane %v227_v30, 4  ;;  %v239_v33 = vrot.slane %v238_v27, 1  ;;  %v225_v34 = vrot.slane %v224_v28, 1 }
  0xb5   : > { %v243_v35 = vadd.f32 %v242_v31, %v241_v29  ;;  %v229_v36 = vadd.f32 %v228_v32, %v227_v30  ;;  %v240_v37 = vadd.f32 %v239_v33, %v238_v27  ;;  %v226_v38 = vadd.f32 %v225_v34, %v224_v28 }
  0xb7   : > { %v244_v39 = vrot.slane %v243_v35, 2  ;;  %v230_v40 = vrot.slane %v229_v36, 2  ;;  %v255_v41 = vsel %vm248_vm1, %v240_v37, -inf  ;;  %v249_v42 = vsel %vm248_vm1, %v226_v38, -inf }
  0xb8   : > { %256 = vmax.xlane.f32.xlu0 %v255_v41  ;;  %250 = vmax.xlane.f32.xlu2 %v249_v42 }
  0xb9   : > { %v245_v43 = vadd.f32 %v244_v39, %v243_v35  ;;  %v231_v44 = vadd.f32 %v230_v40, %v229_v36  ;;  %v866_v36 = vand.u32 127, %v188_v0 }
  0xbb   : > { %v246_v45 = vrot.slane %v245_v43, 1  ;;  %v232_v46 = vrot.slane %v231_v44, 1 }
  0xbd   : > { %v247_v47 = vadd.f32 %v246_v45, %v245_v43  ;;  %v233_v48 = vadd.f32 %v232_v46, %v231_v44 }
  0xbf   : > { %v258_v49 = vsel %vm248_vm1, %v247_v47, -inf  ;;  %v252_v50 = vsel %vm248_vm1, %v233_v48, -inf }
  0xc0   : > { %259 = vmax.xlane.f32.xlu1 %v258_v49  ;;  %253 = vmax.xlane.f32.xlu2 %v252_v50 }
 0x12b   : > { %v257_v51 = vpop.xlane.xlu0 %256  ;;  %v251_v52 = vpop.xlane.xlu2 %250 }
 0x12c   : > { %v263_v53 = vsub.f32 %v240_v37, %v257_v51  ;;  %v261_v54 = vsub.f32 %v226_v38, %v251_v52 }
 0x12e   : > { %v269_v55 = vmul.f32 1.442695, %v263_v53  ;;  %v265_v56 = vmul.f32 1.442695, %v261_v54 }
 0x130   : > { %583 = vpow2.f32 %v269_v55 }
 0x131   : > { %585 = vpow2.f32 %v265_v56 }
 0x133   : > { %v260_v57 = vpop.xlane.xlu1 %259  ;;  %v254_v58 = vpop.xlane.xlu2 %253 }
 0x134   : > { %v264_v59 = vsub.f32 %v247_v47, %v260_v57  ;;  %v262_v60 = vsub.f32 %v233_v48, %v254_v58 }
 0x136   : > { %v584_v61 = vpop.eup %583  ;;  %v271_v62 = vmul.f32 1.442695, %v264_v59  ;;  %v267_v63 = vmul.f32 1.442695, %v262_v60 }
 0x137   : > { %v586_v1 = vpop.eup %585  ;;  %v303_v2 = vmul.f32 %v584_v61, %v820_v7  ;;  %v279_v16 = vsel %vm248_vm1, %v584_v61, 0.0 }
 0x138   : > { %587 = vpow2.f32 %v271_v62  ;;  %v273_v3 = vsel %vm248_vm1, %v586_v1, 0.0  ;;  %v301_v21 = vmul.f32 %v586_v1, %v823_v8 }
 0x139   : > { %589 = vpow2.f32 %v267_v63  ;;  %274 = vadd.xlane.f32.xlu2 %v273_v3  ;;  %v311_v4 = vsel %vm219_vm0, %v303_v2, 0.0  ;;  %v319_v15 = vmul.f32 %v303_v2, %v820_v7 }
 0x13a   : > { %312 = vadd.xlane.f32.xlu0 %v311_v4  ;;  %v305_v22 = vsel %vm219_vm0, %v301_v21, 0.0  ;;  %v317_v7 = vmul.f32 %v301_v21, %v823_v8 }
 0x13b   : > { %v327_v17 = vsel %vm219_vm0, %v319_v15, 0.0 }
 0x13c   : > { %v321_v23 = vsel %vm219_vm0, %v317_v7, 0.0 }
 0x13e   : > { %v588_v5 = vpop.eup %587 }
 0x13f   : > { %v590_v6 = vpop.eup %589  ;;  %v304_v9 = vmul.f32 %v588_v5, %v830_v19  ;;  %v282_v18 = vsel %vm248_vm1, %v588_v5, 0.0 }
 0x140   : > { %v276_v10 = vsel %vm248_vm1, %v590_v6, 0.0  ;;  %v302_v11 = vmul.f32 %v590_v6, %v833_v20 }
 0x141   : > { %277 = vadd.xlane.f32.xlu2 %v276_v10  ;;  %v314_v12 = vsel %vm219_vm0, %v304_v9, 0.0  ;;  %v320_v24 = vmul.f32 %v304_v9, %v830_v19 }
 0x142   : > { %315 = vadd.xlane.f32.xlu1 %v314_v12  ;;  %v318_v13 = vmul.f32 %v302_v11, %v833_v20  ;;  %v308_v20 = vsel %vm219_vm0, %v302_v11, 0.0 }
 0x143   : > { %v330_v25 = vsel %vm219_vm0, %v320_v24, 0.0 }
 0x144   : > { %v324_v14 = vsel %vm219_vm0, %v318_v13, 0.0 }
 0x145   : > { %325 = vadd.xlane.f32.xlu0 %v324_v14 }
 0x149   : > { %280 = vadd.xlane.f32.xlu2 %v279_v16 }
 0x14a   : > { %328 = vadd.xlane.f32.xlu1 %v327_v17 }
 0x151   : > { %283 = vadd.xlane.f32.xlu2 %v282_v18 }
 0x159   : > { %306 = vadd.xlane.f32.xlu2 %v305_v22 }
 0x161   : > { %309 = vadd.xlane.f32.xlu2 %v308_v20 }
 0x169   : > { %322 = vadd.xlane.f32.xlu2 %v321_v23 }
 0x171   : > { %331 = vadd.xlane.f32.xlu2 %v330_v25 }
 0x1ac   : > { %v275_v26 = vpop.xlane.xlu2 %274 }
 0x1ad   : > { %591 = vrcp.f32 %v275_v26  ;;  %v313_v38 = vpop.xlane.xlu0 %312 }
 0x1b3   : > { %v592_v29 = vpop.eup %591 }
 0x1b4   : > { %v278_v27 = vpop.xlane.xlu2 %277  ;;  %v289_v8 = vmul.f32 %v592_v29, %v275_v26 }
 0x1b5   : > { %v316_v30 = vpop.xlane.xlu1 %315 }
 0x1b6   : > { %v293_v19 = vsub.f32 2.0, %v289_v8 }
 0x1b8   : > { %v297_v43 = vmul.f32 %v592_v29, %v293_v19  ;;  %v326_v60 = vpop.xlane.xlu0 %325 }
 0x1bc   : > { %v281_v28 = vpop.xlane.xlu2 %280 }
 0x1bd   : > { %593 = vrcp.f32 %v281_v28  ;;  %v329_v42 = vpop.xlane.xlu1 %328 }
 0x1be   : > { %595 = vrcp.f32 %v278_v27 }
 0x1c3   : > { %v594_v31 = vpop.eup %593 }
 0x1c4   : > { %v291_v32 = vmul.f32 %v594_v31, %v281_v28  ;;  %v284_v33 = vpop.xlane.xlu2 %283  ;;  %v596_v35 = vpop.eup %595 }
 0x1c5   : > { %597 = vrcp.f32 %v284_v33  ;;  %v290_v41 = vmul.f32 %v596_v35, %v278_v27 }
 0x1c6   : > { %v295_v34 = vsub.f32 2.0, %v291_v32 }
 0x1c7   : > { %v294_v51 = vsub.f32 2.0, %v290_v41 }
 0x1c8   : > { %v299_v37 = vmul.f32 %v594_v31, %v295_v34 }
 0x1c9   : > { %v298_v55 = vmul.f32 %v596_v35, %v294_v51 }
 0x1ca   : > { %v335_v39 = vmul.f32 %v313_v38, %v299_v37  ;;  %v339_v44 = vmul.f32 %v329_v42, %v299_v37 }
 0x1cb   : > { %v598_v40 = vpop.eup %597  ;;  %v338_v61 = vmul.f32 %v326_v60, %v298_v55 }
 0x1cc   : > { %v343_v45 = vmul.f32 %v335_v39, %v335_v39  ;;  %v409_v0 = vperm.slane %v335_v39, %v866_v36  ;;  %v292_v46 = vmul.f32 %v598_v40, %v284_v33  ;;  %v307_v47 = vpop.xlane.xlu2 %306 }
 0x1cd   : > { %v333_v48 = vmul.f32 %v307_v47, %v297_v43 }
 0x1ce   : > { %v347_v49 = vsub.f32 %v339_v44, %v343_v45  ;;  %418 = vst.msk [vmem:[%s871_s30 + $0x4] sm:$0x1] %vm415_vm2, %v409_v0  ;;  %v296_v50 = vsub.f32 2.0, %v292_v46 }
 0x1cf   : > { %v407_v52 = vperm.slane %v333_v48, %v866_v36  ;;  %v341_v10 = vmul.f32 %v333_v48, %v333_v48 }
 0x1d0   : > { %v351_v53 = vmax.f32 %v347_v49, 1e-10  ;;  %v300_v54 = vmul.f32 %v598_v40, %v296_v50 }
 0x1d1   : > { %416 = vst.msk [vmem:[%s871_s30] sm:$0x1] %vm415_vm2, %v407_v52 }
 0x1d2   : > { %599 = vrsqrt.f32 %v351_v53  ;;  %v336_v56 = vmul.f32 %v316_v30, %v300_v54  ;;  %vm384_vm3 = vcmp.eq.f32.partialorder %v351_v53, inf  ;;  %v387_v18 = vand.u32 2147483648, %v351_v53 }
 0x1d3   : > { %vm386_vm4 = vcmp.eq.f32.partialorder %v351_v53, 0.0 }
 0x1d4   : > { %v310_v57 = vpop.xlane.xlu2 %309  ;;  %v410_v59 = vperm.slane %v336_v56, %v866_v36  ;;  %v344_v7 = vmul.f32 %v336_v56, %v336_v56 }
 0x1d5   : > { %v334_v58 = vmul.f32 %v310_v57, %v298_v55 }
 0x1d6   : > { %419 = vst.msk [vmem:[%s871_s30 + $0x6] sm:$0x1] %vm415_vm2, %v410_v59 }
 0x1d7   : > { %v342_v62 = vmul.f32 %v334_v58, %v334_v58  ;;  %v408_v63 = vperm.slane %v334_v58, %v866_v36 }
 0x1d8   : > { %v600_v1 = vpop.eup %599 }
 0x1d9   : > { %v378_v2 = vmul.f32 %v600_v1, %v351_v53  ;;  %v346_v3 = vsub.f32 %v338_v61, %v342_v62  ;;  %417 = vst.msk [vmem:[%s871_s30 + $0x2] sm:$0x1] %vm415_vm2, %v408_v63 }
 0x1db   : > { %v379_v4 = vmul.f32 %v600_v1, %v378_v2  ;;  %v350_v5 = vmax.f32 %v346_v3, 1e-10 }
 0x1dc   : > { %v323_v6 = vpop.xlane.xlu2 %322 }
 0x1dd   : > { %v380_v9 = vmul.f32 0.5, %v379_v4  ;;  %601 = vrsqrt.f32 %v350_v5  ;;  %v337_v11 = vmul.f32 %v323_v6, %v297_v43  ;;  %vm372_vm5 = vcmp.eq.f32.partialorder %v350_v5, inf }
 0x1de   : > { %v375_v19 = vand.u32 2147483648, %v350_v5  ;;  %vm374_vm6 = vcmp.eq.f32.partialorder %v350_v5, 0.0 }
 0x1df   : > { %v381_v12 = vsub.f32 1.5, %v380_v9  ;;  %v345_v13 = vsub.f32 %v337_v11, %v341_v10 }
 0x1e1   : > { %v382_v14 = vmul.f32 %v600_v1, %v381_v12  ;;  %v349_v15 = vmax.f32 %v345_v13, 1e-10 }
 0x1e3   : > { %v602_v16 = vpop.eup %601  ;;  %v383_v17 = vmul.f32 %v382_v14, %v351_v53  ;;  %603 = vrsqrt.f32 %v349_v15  ;;  %vm360_vm7 = vcmp.eq.f32.partialorder %v349_v15, inf  ;;  %v363_v0 = vand.u32 2147483648, %v349_v15 }
 0x1e4   : > { %v366_v21 = vmul.f32 %v602_v16, %v350_v5  ;;  %v332_v22 = vpop.xlane.xlu2 %331  ;;  %vm362_vm8 = vcmp.eq.f32.partialorder %v349_v15, 0.0 }
 0x1e5   : > { %v385_v20 = vsel %vm384_vm3, %v351_v53, %v383_v17  ;;  %v340_v23 = vmul.f32 %v332_v22, %v300_v54 }
 0x1e6   : > { %v388_v24 = vsel %vm386_vm4, %v387_v18, %v385_v20  ;;  %v367_v25 = vmul.f32 %v602_v16, %v366_v21 }
 0x1e7   : > { %v426_v26 = vperm.slane %v388_v24, %v866_v36  ;;  %v348_v27 = vsub.f32 %v340_v23, %v344_v7 }
 0x1e8   : > { %v368_v28 = vmul.f32 0.5, %v367_v25 }
 0x1e9   : > { %434 = vst.msk [vmem:[%s871_s30 + $0x5] sm:$0x1] %vm415_vm2, %v426_v26  ;;  %v352_v29 = vmax.f32 %v348_v27, 1e-10  ;;  %v604_v30 = vpop.eup %603 }
 0x1ea   : > { %v369_v31 = vsub.f32 1.5, %v368_v28  ;;  %v354_v8 = vmul.f32 %v604_v30, %v349_v15 }
 0x1eb   : > { %605 = vrsqrt.f32 %v352_v29  ;;  %vm396_vm9 = vcmp.eq.f32.partialorder %v352_v29, inf  ;;  %v399_v53 = vand.u32 2147483648, %v352_v29  ;;  %vm398_vm10 = vcmp.eq.f32.partialorder %v352_v29, 0.0 }
 0x1ec   : > { %v370_v32 = vmul.f32 %v602_v16, %v369_v31  ;;  %v355_v33 = vmul.f32 %v604_v30, %v354_v8 }
 0x1ee   : > { %v371_v34 = vmul.f32 %v370_v32, %v350_v5  ;;  %v356_v35 = vmul.f32 0.5, %v355_v33 }
 0x1f0   : > { %v373_v37 = vsel %vm372_vm5, %v350_v5, %v371_v34  ;;  %v357_v40 = vsub.f32 1.5, %v356_v35 }
 0x1f1   : > { %v606_v38 = vpop.eup %605  ;;  %v376_v39 = vsel %vm374_vm6, %v375_v19, %v373_v37 }
 0x1f2   : > { %v425_v41 = vperm.slane %v376_v39, %v866_v36  ;;  %v390_v42 = vmul.f32 %v606_v38, %v352_v29  ;;  %v358_v43 = vmul.f32 %v604_v30, %v357_v40 }
 0x1f4   : > { %433 = vst.msk [vmem:[%s871_s30 + $0x3] sm:$0x1] %vm415_vm2, %v425_v41  ;;  %v391_v44 = vmul.f32 %v606_v38, %v390_v42  ;;  %v359_v45 = vmul.f32 %v358_v43, %v349_v15 }
 0x1f6   : > { %v392_v46 = vmul.f32 0.5, %v391_v44  ;;  %v361_v47 = vsel %vm360_vm7, %v349_v15, %v359_v45 }
 0x1f7   : > { %v364_v48 = vsel %vm362_vm8, %v363_v0, %v361_v47 }
 0x1f8   : > { %v393_v49 = vsub.f32 1.5, %v392_v46  ;;  %v424_v50 = vperm.slane %v364_v48, %v866_v36 }
 0x1fa   : > { %v394_v51 = vmul.f32 %v606_v38, %v393_v49  ;;  %432 = vst.msk [vmem:[%s871_s30 + $0x1] sm:$0x1] %vm415_vm2, %v424_v50 }
 0x1fc   : > { %v395_v52 = vmul.f32 %v394_v51, %v352_v29 }
 0x1fe   : > { %v397_v54 = vsel %vm396_vm9, %v352_v29, %v395_v52 }
 0x1ff   : > { %v400_v55 = vsel %vm398_vm10, %v399_v53, %v397_v54 }
 0x200   : > { %v427_v56 = vperm.slane %v400_v55, %v866_v36 }
 0x202   : > { %435 = vst.msk [vmem:[%s871_s30 + $0x7] sm:$0x1] %vm415_vm2, %v427_v56 }
 0x203 PF: > { %p13_p8 = scmp.ge.s32.totalorder %s747_s14, 4   ;;  %s917_s9 = smov %s697_s10 }
 0x204   : > { %s918_s10 = smov %s701_s11  ;;  %s919_s11 = smov %s757_s17 }
 0x205   : > { %s920_s12 = smov %s747_s14  ;;  %15 = sbr.rel (!%p13_p8) target bundleno = 4 (0x4), region = 72 }
 0x20a   :  { %457 = vsyncpa [#allocation3], 1 }
 0x20b   :  { %459 = vsyncpa [#allocation3 + $0x1], 1 }
 0x20c   :  { %460 = vsyncpa [#allocation5], 1 }

</bundles_post_ra>
